<compile_context>
chip_gen: v7x
topology: tpu7x:2x2x1
jax: 0.10.0
libtpu: 0.0.40
codegen_flags: <defaults>
</compile_context>

<pallas_src>
import functools
import math

import jax
import jax.numpy as jnp
from jax.experimental import pallas as pl
from jax.experimental.pallas import tpu as pltpu


def _xlogx(v):
    # x*log(x) with the 0*log(0) := 0 convention (compile-time python float).
    return float(v) * math.log(v) if v > 0.0 else 0.0


def _round_down_mult(v, m):
    return (v // m) * m


def _label_smoothing_kernel(x_ref, y_ref, out_ref, m_ref, s_ref, w_ref, *,
                            smoothing, pad_idx, num_classes, n_rows,
                            tile_n, tile_c):
    i = pl.program_id(0)                 # row-tile axis  ("parallel")
    j = pl.program_id(1)                 # class-chunk axis ("arbitrary", inner)
    last_j = pl.num_programs(1) - 1

    ragged_c = (num_classes % tile_c) != 0   # static python bools
    ragged_n = (n_rows % tile_n) != 0

    @pl.when(j == 0)
    def _():
        m_ref[...] = jnp.full_like(m_ref, -jnp.inf)
        s_ref[...] = jnp.zeros_like(s_ref)
        w_ref[...] = jnp.zeros_like(w_ref)

    y = y_ref[...]                                                   # (tn, 1) i32
    cls = j * tile_c + jax.lax.broadcasted_iota(jnp.int32, (tile_n, tile_c), 1)
    cmask = (cls < num_classes) if ragged_c else None

    def load_x():
        # Re-index per pass so the (possibly bf16) tile is streamed per reduction
        # instead of held as one long-lived f32 VMEM temp.
        xf = x_ref[...].astype(jnp.float32)
        if ragged_c:
            xf = jnp.where(cmask, xf, -jnp.inf)
        return xf

    # ---- online log-sum-exp over this class chunk (passes 1 & 2) ----
    m_prev = m_ref[...]
    m_new = jnp.maximum(m_prev, jnp.max(load_x(), axis=-1, keepdims=True))
    s_ref[...] = (s_ref[...] * jnp.exp(m_prev - m_new)
                  + jnp.sum(jnp.exp(load_x() - m_new), axis=-1, keepdims=True))
    m_ref[...] = m_new

    # ---- folded weighted sum  sum_j t[r, j] * x[r, j]  (pass 3) ----
    base = smoothing / (num_classes - 2)
    conf = 1.0 - smoothing
    w = jnp.where(cls == y, jnp.float32(conf), jnp.float32(base))
    w = jnp.where(cls == pad_idx, jnp.float32(0.0), w)
    prod = w * x_ref[...].astype(jnp.float32)
    if ragged_c:
        prod = jnp.where(cmask, prod, 0.0)           # select (NaN-safe), not 0*x
    w_ref[...] += jnp.sum(prod, axis=-1, keepdims=True)

    # ---- finalize this row tile: write its per-row losses (partial output) ----
    @pl.when(j == last_j)
    def _():
        lse = m_ref[...] + jnp.log(s_ref[...])
        # For non-pad rows sum_j t[r, j] == 1, so cross = sum(w*x) - lse,
        # and sum_j t*log t is a compile-time constant.
        t_logt = _xlogx(conf) + (num_classes - 2) * _xlogx(base)
        row_loss = jnp.float32(t_logt) - (w_ref[...] - lse)
        keep = y != pad_idx
        if ragged_n:
            row = i * tile_n + jax.lax.broadcasted_iota(jnp.int32, (tile_n, 1), 0)
            keep = jnp.logical_and(keep, row < n_rows)
        out_ref[...] = jnp.where(keep, row_loss, 0.0)


def _choose_tiles(n, c, itemsize, vmem_capacity, tile_n=None, tile_c=None):
    # VMEM residency budget (double-buffered logits + f32 temps):
    # ~40 MiB on v7x (64 MiB physical), ~80 MiB on v5e/v6e (128 MiB physical).
    budget = int(min(80 << 20, max(24 << 20, vmem_capacity - (24 << 20))))

    def row_bytes(tc):
        # double-buffered logits chunk + ~2 f32-sized temps per row
        return 2 * tc * itemsize + 2 * tc * 4

    if tile_c is None:
        tile_c = c
        if c > 1024 and budget // row_bytes(c) < 128:
            # Vocab-scale C: class-tile (online logsumexp path) so row tiles
            # stay big enough for DMA efficiency.
            tile_c = 8192
            while tile_c > 512 and budget // row_bytes(tile_c) < 256:
                tile_c //= 2
    if tile_c >= c:
        tile_c = c                                   # single chunk covers C
    else:
        tile_c = max(128, _round_down_mult(tile_c, 128))   # lane-aligned

    if tile_n is None:
        tile_n = budget // row_bytes(tile_c)         # byte-based row cap
    row_mult = 8 if itemsize >= 4 else (32 // itemsize)    # sublane packing
    if tile_n >= n:
        tile_n = n
    else:
        tile_n = max(row_mult, _round_down_mult(min(tile_n, 32768), row_mult))
    return int(tile_n), int(tile_c)


def label_smoothing_loss(x, y, *, smoothing=0.1, pad_idx=0, tile_n=None, tile_c=None):
    n, c = x.shape
    itemsize = jnp.dtype(x.dtype).itemsize
    try:
        vmem_capacity = int(pltpu.get_tpu_info().vmem_capacity_bytes)
    except Exception:
        vmem_capacity = 64 << 20                     # conservative fallback
    tn, tc = _choose_tiles(n, c, itemsize, vmem_capacity, tile_n, tile_c)

    grid = (pl.cdiv(n, tn), pl.cdiv(c, tc))
    y2d = y.astype(jnp.int32).reshape(n, 1)

    kernel = functools.partial(
        _label_smoothing_kernel,
        smoothing=float(smoothing), pad_idx=int(pad_idx),
        num_classes=int(c), n_rows=int(n), tile_n=int(tn), tile_c=int(tc))

    # Scoped-VMEM limit = actual residency + headroom, capped under physical.
    needed = (2 * tn * tc * itemsize                 # double-buffered logits block
              + 2 * tn * tc * 4                      # f32 cast / weight temps
              + 8 * tn * 4 + (1 << 16))              # (tn,1) scratch, y, out, slack
    vmem_limit = int(min(vmem_capacity - (2 << 20),
                         max(32 << 20, needed + (4 << 20))))

    per_row = pl.pallas_call(
        kernel,
        out_shape=jax.ShapeDtypeStruct((n, 1), jnp.float32),
        grid_spec=pltpu.PrefetchScalarGridSpec(
            num_scalar_prefetch=0,
            grid=grid,
            in_specs=[
                pl.BlockSpec((tn, tc), lambda i, j: (i, j)),   # logits chunk
                pl.BlockSpec((tn, 1), lambda i, j: (i, 0)),    # targets
            ],
            out_specs=pl.BlockSpec((tn, 1), lambda i, j: (i, 0)),  # per-row loss
            scratch_shapes=[pltpu.VMEM((tn, 1), jnp.float32)] * 3,  # m, s, wsum
        ),
        compiler_params=pltpu.CompilerParams(
            dimension_semantics=("parallel", "arbitrary"),
            vmem_limit_bytes=vmem_limit,
        ),
    )(x, y2d)
    # Tiny (N,1) partial-loss reduction done in plain XLA.
    return jnp.sum(per_row)


def _reference_loss(x, y, *, smoothing=0.1, pad_idx=0):
    # Pure-JAX reference mirroring the PyTorch forward.
    n, c = x.shape
    base = smoothing / (c - 2)
    conf = 1.0 - smoothing
    cls = jnp.arange(c)[None, :]
    t = jnp.full((n, c), base, jnp.float32)
    t = jnp.where(cls == y[:, None], conf, t)
    t = t.at[:, pad_idx].set(0.0)
    t = jnp.where((y == pad_idx)[:, None], 0.0, t)
    logp = jax.nn.log_softmax(x.astype(jnp.float32), axis=-1)
    t_log_t = jnp.where(t > 0, t * jnp.log(jnp.where(t > 0, t, 1.0)), 0.0)
    return jnp.sum(t_log_t - t * logp)


if __name__ == "__main__":
    key = jax.random.PRNGKey(0)
    kx, ky, kx2, ky2, kx3, ky3 = jax.random.split(key, 6)

    # 1) Small single-tile case (N=16, C=32), exercising pad rows.
    N, C = 16, 32
    x = jax.random.normal(kx, (N, C), dtype=jnp.float32)
    y = jax.random.randint(ky, (N,), 0, C, dtype=jnp.int32)
    y = y.at[0].set(0).at[5].set(0)
    loss = jax.block_until_ready(label_smoothing_loss(x, y, smoothing=0.1, pad_idx=0))
    ref = _reference_loss(x, y, smoothing=0.1, pad_idx=0)
    assert jnp.allclose(loss, ref, atol=1e-3, rtol=1e-3), (loss, ref)

    # 2) Multi-row-tile, ragged N (40 rows, 16-row tiles -> partial last block).
    N2 = 40
    x2 = jax.random.normal(kx2, (N2, C), dtype=jnp.float32)
    y2 = jax.random.randint(ky2, (N2,), 0, C, dtype=jnp.int32)
    y2 = y2.at[3].set(0)
    loss2 = jax.block_until_ready(
        label_smoothing_loss(x2, y2, smoothing=0.1, pad_idx=0, tile_n=16))
    ref2 = _reference_loss(x2, y2, smoothing=0.1, pad_idx=0)
    assert jnp.allclose(loss2, ref2, atol=1e-3, rtol=1e-3), (loss2, ref2)

    # 3) Class-tiled online-logsumexp path, ragged N and ragged C.
    N3, C3 = 20, 300
    x3 = jax.random.normal(kx3, (N3, C3), dtype=jnp.float32)
    y3 = jax.random.randint(ky3, (N3,), 0, C3, dtype=jnp.int32)
    y3 = y3.at[7].set(0)
    loss3 = jax.block_until_ready(
        label_smoothing_loss(x3, y3, smoothing=0.1, pad_idx=0, tile_n=8, tile_c=128))
    ref3 = _reference_loss(x3, y3, smoothing=0.1, pad_idx=0)
    assert jnp.allclose(loss3, ref3, atol=1e-3, rtol=1e-3), (loss3, ref3)

    print("KERNEL_OK")
</pallas_src>

<mosaic_0001>
module attributes {stable_mosaic.version = 11 : i64} {
  func.func @_label_smoothing_kernel(%arg0: i32, %arg1: i32, %arg2: memref<16x32xf32, #tpu.memory_space<vmem>>, %arg3: memref<16x1xi32, #tpu.memory_space<vmem>>, %arg4: memref<16x1xf32, #tpu.memory_space<vmem>>, %arg5: memref<16x1xf32, #tpu.memory_space<vmem>>, %arg6: memref<16x1xf32, #tpu.memory_space<vmem>>, %arg7: memref<16x1xf32, #tpu.memory_space<vmem>>) attributes {dimension_semantics = [#tpu.dimension_semantics<parallel>, #tpu.dimension_semantics<arbitrary>], iteration_bounds = array<i64: 1, 1>, scalar_prefetch = 0 : i64, scratch_operands = 3 : i64, tpu.core_type = #tpu.core_type<tc>, window_params = [{transform_indices = @transform_0, window_bounds = array<i64: 16, 32>}, {transform_indices = @transform_1, window_bounds = array<i64: 16, 1>}, {transform_indices = @transform_2, window_bounds = array<i64: 16, 1>}]} {
    %c0_i32 = arith.constant 0 : i32
    %0 = arith.cmpi eq, %arg1, %c0_i32 : i32
    %1 = arith.extui %0 : i1 to i32
    %c0_i32_0 = arith.constant 0 : i32
    %2 = arith.cmpi ne, %1, %c0_i32_0 : i32
    scf.if %2 {
      %cst_28 = arith.constant 0xFF800000 : f32
      %45 = vector.broadcast %cst_28 : f32 to vector<16x1xf32>
      %c0_29 = arith.constant 0 : index
      %c0_30 = arith.constant 0 : index
      %46 = vector.load %arg5[%c0_29, %c0_30] : memref<16x1xf32, #tpu.memory_space<vmem>>, vector<16x1xf32>
      tpu.vector_store %arg5[%c0_29, %c0_30], %45 {strides = array<i32>} : memref<16x1xf32, #tpu.memory_space<vmem>>, vector<16x1xf32>,
      %cst_31 = arith.constant 0.000000e+00 : f32
      %47 = vector.broadcast %cst_31 : f32 to vector<16x1xf32>
      %c0_32 = arith.constant 0 : index
      %c0_33 = arith.constant 0 : index
      %48 = vector.load %arg6[%c0_32, %c0_33] : memref<16x1xf32, #tpu.memory_space<vmem>>, vector<16x1xf32>
      tpu.vector_store %arg6[%c0_32, %c0_33], %47 {strides = array<i32>} : memref<16x1xf32, #tpu.memory_space<vmem>>, vector<16x1xf32>,
      %cst_34 = arith.constant 0.000000e+00 : f32
      %49 = vector.broadcast %cst_34 : f32 to vector<16x1xf32>
      %c0_35 = arith.constant 0 : index
      %c0_36 = arith.constant 0 : index
      %50 = vector.load %arg7[%c0_35, %c0_36] : memref<16x1xf32, #tpu.memory_space<vmem>>, vector<16x1xf32>
      tpu.vector_store %arg7[%c0_35, %c0_36], %49 {strides = array<i32>} : memref<16x1xf32, #tpu.memory_space<vmem>>, vector<16x1xf32>,
    } else {
    }
    %c0 = arith.constant 0 : index
    %c0_1 = arith.constant 0 : index
    %3 = vector.load %arg3[%c0, %c0_1] : memref<16x1xi32, #tpu.memory_space<vmem>>, vector<16x1xi32>
    %c32_i32 = arith.constant 32 : i32
    %4 = arith.muli %arg1, %c32_i32 : i32
    %5 = tpu.iota {dimensions = array<i32: 1>} : vector<16x32xi32>
    %6 = vector.broadcast %4 : i32 to vector<16x32xi32>
    %7 = arith.addi %6, %5 : vector<16x32xi32>
    %c0_2 = arith.constant 0 : index
    %c0_3 = arith.constant 0 : index
    %8 = vector.load %arg5[%c0_2, %c0_3] : memref<16x1xf32, #tpu.memory_space<vmem>>, vector<16x1xf32>
    %c0_4 = arith.constant 0 : index
    %c0_5 = arith.constant 0 : index
    %9 = vector.load %arg2[%c0_4, %c0_5] : memref<16x32xf32, #tpu.memory_space<vmem>>, vector<16x32xf32>
    %cst = arith.constant dense<0xFF800000> : vector<16xf32>
    %10 = vector.multi_reduction <maximumf>, %9, %cst [1] : vector<16x32xf32> to vector<16xf32>
    %11 = vector.shape_cast %10 : vector<16xf32> to vector<16x1xf32>
    %12 = arith.maximumf %8, %11 : vector<16x1xf32>
    %c0_6 = arith.constant 0 : index
    %c0_7 = arith.constant 0 : index
    %13 = vector.load %arg6[%c0_6, %c0_7] : memref<16x1xf32, #tpu.memory_space<vmem>>, vector<16x1xf32>
    %14 = arith.subf %8, %12 : vector<16x1xf32>
    %15 = math.exp %14 : vector<16x1xf32>
    %16 = arith.mulf %13, %15 : vector<16x1xf32>
    %c0_8 = arith.constant 0 : index
    %c0_9 = arith.constant 0 : index
    %17 = vector.load %arg2[%c0_8, %c0_9] : memref<16x32xf32, #tpu.memory_space<vmem>>, vector<16x32xf32>
    %18 = vector.broadcast %12 : vector<16x1xf32> to vector<16x32xf32>
    %19 = arith.subf %17, %18 : vector<16x32xf32>
    %20 = math.exp %19 : vector<16x32xf32>
    %cst_10 = arith.constant dense<0.000000e+00> : vector<16xf32>
    %21 = vector.multi_reduction <add>, %20, %cst_10 [1] : vector<16x32xf32> to vector<16xf32>
    %22 = vector.shape_cast %21 : vector<16xf32> to vector<16x1xf32>
    %23 = arith.addf %16, %22 : vector<16x1xf32>
    %c0_11 = arith.constant 0 : index
    %c0_12 = arith.constant 0 : index
    %24 = vector.load %arg6[%c0_11, %c0_12] : memref<16x1xf32, #tpu.memory_space<vmem>>, vector<16x1xf32>
    tpu.vector_store %arg6[%c0_11, %c0_12], %23 {strides = array<i32>} : memref<16x1xf32, #tpu.memory_space<vmem>>, vector<16x1xf32>,
    %c0_13 = arith.constant 0 : index
    %c0_14 = arith.constant 0 : index
    %25 = vector.load %arg5[%c0_13, %c0_14] : memref<16x1xf32, #tpu.memory_space<vmem>>, vector<16x1xf32>
    tpu.vector_store %arg5[%c0_13, %c0_14], %12 {strides = array<i32>} : memref<16x1xf32, #tpu.memory_space<vmem>>, vector<16x1xf32>,
    %26 = vector.broadcast %3 : vector<16x1xi32> to vector<16x32xi32>
    %27 = arith.cmpi eq, %7, %26 : vector<16x32xi32>
    %cst_15 = arith.constant 0.899999976 : f32
    %cst_16 = arith.constant 0.00333333341 : f32
    %28 = vector.broadcast %cst_15 : f32 to vector<16x32xf32>
    %29 = vector.broadcast %cst_16 : f32 to vector<16x32xf32>
    %30 = arith.select %27, %28, %29 : vector<16x32xi1>, vector<16x32xf32>
    %c0_i32_17 = arith.constant 0 : i32
    %31 = vector.broadcast %c0_i32_17 : i32 to vector<16x32xi32>
    %32 = arith.cmpi eq, %7, %31 : vector<16x32xi32>
    %cst_18 = arith.constant 0.000000e+00 : f32
    %33 = vector.broadcast %cst_18 : f32 to vector<16x32xf32>
    %34 = arith.select %32, %33, %30 : vector<16x32xi1>, vector<16x32xf32>
    %c0_19 = arith.constant 0 : index
    %c0_20 = arith.constant 0 : index
    %35 = vector.load %arg2[%c0_19, %c0_20] : memref<16x32xf32, #tpu.memory_space<vmem>>, vector<16x32xf32>
    %36 = arith.mulf %34, %35 : vector<16x32xf32>
    %c0_21 = arith.constant 0 : index
    %c0_22 = arith.constant 0 : index
    %37 = vector.load %arg7[%c0_21, %c0_22] : memref<16x1xf32, #tpu.memory_space<vmem>>, vector<16x1xf32>
    %cst_23 = arith.constant dense<0.000000e+00> : vector<16xf32>
    %38 = vector.multi_reduction <add>, %36, %cst_23 [1] : vector<16x32xf32> to vector<16xf32>
    %39 = vector.shape_cast %38 : vector<16xf32> to vector<16x1xf32>
    %40 = arith.addf %37, %39 : vector<16x1xf32>
    %c0_24 = arith.constant 0 : index
    %c0_25 = arith.constant 0 : index
    %41 = vector.load %arg7[%c0_24, %c0_25] : memref<16x1xf32, #tpu.memory_space<vmem>>, vector<16x1xf32>
    tpu.vector_store %arg7[%c0_24, %c0_25], %40 {strides = array<i32>} : memref<16x1xf32, #tpu.memory_space<vmem>>, vector<16x1xf32>,
    %c0_i32_26 = arith.constant 0 : i32
    %42 = arith.cmpi eq, %arg1, %c0_i32_26 : i32
    %43 = arith.extui %42 : i1 to i32
    %c0_i32_27 = arith.constant 0 : i32
    %44 = arith.cmpi ne, %43, %c0_i32_27 : i32
    scf.if %44 {
      %c0_28 = arith.constant 0 : index
      %c0_29 = arith.constant 0 : index
      %45 = vector.load %arg5[%c0_28, %c0_29] : memref<16x1xf32, #tpu.memory_space<vmem>>, vector<16x1xf32>
      %c0_30 = arith.constant 0 : index
      %c0_31 = arith.constant 0 : index
      %46 = vector.load %arg6[%c0_30, %c0_31] : memref<16x1xf32, #tpu.memory_space<vmem>>, vector<16x1xf32>
      %47 = math.log %46 : vector<16x1xf32>
      %48 = arith.addf %45, %47 : vector<16x1xf32>
      %c0_32 = arith.constant 0 : index
      %c0_33 = arith.constant 0 : index
      %49 = vector.load %arg7[%c0_32, %c0_33] : memref<16x1xf32, #tpu.memory_space<vmem>>, vector<16x1xf32>
      %50 = arith.subf %49, %48 : vector<16x1xf32>
      %cst_34 = arith.constant -0.665202737 : f32
      %51 = vector.broadcast %cst_34 : f32 to vector<16x1xf32>
      %52 = arith.subf %51, %50 : vector<16x1xf32>
      %c0_i32_35 = arith.constant 0 : i32
      %53 = vector.broadcast %c0_i32_35 : i32 to vector<16x1xi32>
      %54 = arith.cmpi ne, %3, %53 : vector<16x1xi32>
      %cst_36 = arith.constant 0.000000e+00 : f32
      %55 = vector.broadcast %cst_36 : f32 to vector<16x1xf32>
      %56 = arith.select %54, %52, %55 : vector<16x1xi1>, vector<16x1xf32>
      %c0_37 = arith.constant 0 : index
      %c0_38 = arith.constant 0 : index
      %57 = vector.load %arg4[%c0_37, %c0_38] : memref<16x1xf32, #tpu.memory_space<vmem>>, vector<16x1xf32>
      tpu.vector_store %arg4[%c0_37, %c0_38], %56 {strides = array<i32>} : memref<16x1xf32, #tpu.memory_space<vmem>>, vector<16x1xf32>,
    } else {
    }
    return
  }
  func.func @transform_0(%arg0: i32, %arg1: i32) -> (i32, i32) {
    %c0_i32 = arith.constant 0 : i32
    return %arg0, %arg1 : i32, i32
  }
  func.func @transform_1(%arg0: i32, %arg1: i32) -> (i32, i32) {
    %c0_i32 = arith.constant 0 : i32
    %c0_i32_0 = arith.constant 0 : i32
    return %arg0, %c0_i32 : i32, i32
  }
  func.func @transform_2(%arg0: i32, %arg1: i32) -> (i32, i32) {
    %c0_i32 = arith.constant 0 : i32
    %c0_i32_0 = arith.constant 0 : i32
    return %arg0, %c0_i32 : i32, i32
  }
}

</mosaic_0001>

<bundles_post_ra>
// kernel: tpu_custom_call.1
= control target key start
LH: loop header
LB: loop body
LE: loop exit
PB: predicated region body
PF: predicated region fallthrough
CT: control target
= control target key end

     0   :  { %vm33_vm0 = vcmask 261120   ;;  %vm15_vm1 = vcmask 7168   ;;  %v157_v2 = vmov -inf   ;;  %v158_v5 = vmov 0   ;;  %s224_s0 = inlined_call_operand.vmem [shape: f32[16,32], index: 0, kind: input, shape index: {}]   ;;  %s225_s1 = inlined_call_operand.vmem [shape: s32[16,1], index: 1, kind: input, shape index: {}]   ;;  %s226_s2 = inlined_call_operand.vmem [shape: f32[16,1], index: 2, kind: output, shape index: {}]  }
   0x1   :  { %v31_v0 = vld [vmem:[%s224_s0] sm:$0xff]  ;;  %v32_v1 = vld [vmem:[%s224_s0 + $0x8] sm:$0xff]  ;;  %16 = vst.msk [vmem:[#allocation2] sm:$0xff] %vm15_vm1, %v157_v2  ;;  %17 = vst.msk [vmem:[#allocation2 + $0x8] sm:$0xff] %vm15_vm1, %v157_v2  ;;  %143 = vset.pattern.permute.xlu1 %v158_v5  ;;  %144 = vset.pattern.permute.xlu0 %v158_v5  ;;  %v159_v6 = vmov 0.0   ;;  %v25_v17 = vlaneseq }
   0x2   :  { %v34_v3 = vsel %vm33_vm0, %v31_v0, -inf  ;;  %v37_v4 = vsel %vm33_vm0, %v32_v1, -inf  ;;  %18 = vst.msk [vmem:[#allocation3] sm:$0xff] %vm15_vm1, %v159_v6  ;;  %19 = vst.msk [vmem:[#allocation3 + $0x8] sm:$0xff] %vm15_vm1, %v159_v6  ;;  %v193_v7 = vld [vmem:[%s225_s1] sm:$0xff]  ;;  %v201_v16 = vld [vmem:[%s225_s1 + $0x8] sm:$0xff] }
   0x3   :  { %35 = vmax.xlane.f32.xlu0 %v34_v3  ;;  %20 = vst.msk [vmem:[#allocation4] sm:$0xff] %vm15_vm1, %v159_v6  ;;  %21 = vst.msk [vmem:[#allocation4 + $0x8] sm:$0xff] %vm15_vm1, %v159_v6  ;;  %v26_v18 = vand.u32 127, %v25_v17  ;;  %v160_v20 = vmov 0.0033333334   ;;  %vm129_vm5 = vcmp.ne.s32.totalorder %v193_v7, 0 }
   0x4   :  { %vm130_vm6 = vcmp.ne.s32.totalorder %v201_v16, 0 }
   0x5   :  { %vm91_vm3 = vcmp.eq.s32.totalorder %v26_v18, 0 }
   0x7   :  { %38 = vmax.xlane.f32.xlu0 %v37_v4 }
   0x8   :  { %v29_v8 = vld [vmem:[#allocation2] sm:$0xff]  ;;  %v30_v11 = vld [vmem:[#allocation2 + $0x8] sm:$0xff] }
   0x9   :  { %v42_v46 = vld [vmem:[#allocation3] sm:$0xff]  ;;  %v43_v50 = vld [vmem:[#allocation3 + $0x8] sm:$0xff] }
   0xa   :  { %v98_v40 = vld [vmem:[#allocation4] sm:$0xff]  ;;  %v99_v55 = vld [vmem:[#allocation4 + $0x8] sm:$0xff] }
  0x1d   :  { %82 = vperm.xlu0 %144, %v193_v7  }
  0x90   :  { %v36_v9 = vpop.xlane.xlu0 %35 }
  0x91   :  { %v40_v10 = vmax.f32 %v29_v8, %v36_v9 }
  0x93   :  { %v44_v12 = vsub.f32 %v29_v8, %v40_v10  ;;  %79 = vst.msk [vmem:[#allocation2] sm:$0xff] %vm15_vm1, %v40_v10  ;;  %54 = vperm.xlu1 %143, %v40_v10  }
  0x94   :  { %v39_v13 = vpop.xlane.xlu0 %38 }
  0x95   :  { %v41_v14 = vmax.f32 %v30_v11, %v39_v13  ;;  %v46_v43 = vmul.f32 1.442695, %v44_v12 }
  0x97   :  { %v45_v15 = vsub.f32 %v30_v11, %v41_v14  ;;  %80 = vst.msk [vmem:[#allocation2 + $0x8] sm:$0xff] %vm15_vm1, %v41_v14  ;;  %59 = vperm.xlu1 %143, %v41_v14  }
  0x99   :  { %v48_v44 = vmul.f32 1.442695, %v45_v15 }
  0x9a   :  { %v113_v62 = vld [vmem:[#allocation2] sm:$0xff] }
  0x9b   :  { %85 = vperm.xlu1 %143, %v201_v16  }
  0x9c   :  { %v83_v19 = vpop.permute.xlu0 %82 }
  0x9d   :  { %vm87_vm2 = vcmp.eq.s32.totalorder %v26_v18, %v83_v19 }
  0x9e   :  { %v89_v21 = vsel %vm87_vm2, 0.9, %v160_v20  ;;  %v114_v4 = vld [vmem:[#allocation2 + $0x8] sm:$0xff] }
  0x9f   :  { %v92_v22 = vsel %vm91_vm3, 0.0, %v89_v21 }
  0xa0   :  { %v96_v23 = vmul.f32 %v92_v22, %v31_v0 }
  0xa2   :  { %v100_v24 = vsel %vm33_vm0, %v96_v23, 0.0 }
  0xa3   :  { %101 = vadd.xlane.f32.xlu0 %v100_v24 }
 0x112   :  { %v55_v25 = vpop.permute.xlu1 %54 }
 0x113   :  { %v62_v26 = vsub.f32 %v31_v0, %v55_v25 }
 0x115   :  { %v64_v27 = vmul.f32 1.442695, %v62_v26 }
 0x116   :  { %v60_v28 = vpop.permute.xlu1 %59 }
 0x117   :  { %145 = vpow2.f32 %v64_v27  ;;  %v63_v29 = vsub.f32 %v32_v1, %v60_v28 }
 0x119   :  { %v66_v30 = vmul.f32 1.442695, %v63_v29 }
 0x11a   :  { %v86_v31 = vpop.permute.xlu1 %85 }
 0x11b   :  { %147 = vpow2.f32 %v66_v30  ;;  %vm88_vm4 = vcmp.eq.s32.totalorder %v26_v18, %v86_v31 }
 0x11c   :  { %v90_v32 = vsel %vm88_vm4, 0.9, %v160_v20  ;;  %149 = vpow2.f32 %v46_v43 }
 0x11d   :  { %v93_v35 = vsel %vm91_vm3, 0.0, %v90_v32  ;;  %151 = vpow2.f32 %v48_v44 }
 0x11e   :  { %v97_v38 = vmul.f32 %v93_v35, %v32_v1 }
 0x120   :  { %v103_v39 = vsel %vm33_vm0, %v97_v38, 0.0 }
 0x121   :  { %v146_v33 = vpop.eup %145 }
 0x122   :  { %v68_v34 = vsel %vm33_vm0, %v146_v33, 0.0 }
 0x123   :  { %69 = vadd.xlane.f32.xlu1 %v68_v34 }
 0x125   :  { %v148_v36 = vpop.eup %147 }
 0x126   :  { %v71_v37 = vsel %vm33_vm0, %v148_v36, 0.0  ;;  %v150_v45 = vpop.eup %149 }
 0x127   :  { %72 = vadd.xlane.f32.xlu1 %v71_v37  ;;  %v50_v47 = vmul.f32 %v150_v45, %v42_v46  ;;  %v152_v48 = vpop.eup %151 }
 0x128   :  { %v51_v52 = vmul.f32 %v152_v48, %v43_v50 }
 0x12b   :  { %104 = vadd.xlane.f32.xlu1 %v103_v39 }
 0x130   :  { %v102_v41 = vpop.xlane.xlu0 %101 }
 0x131   :  { %v106_v42 = vadd.f32 %v102_v41, %v98_v40 }
 0x133   :  { %108 = vst.msk [vmem:[#allocation4] sm:$0xff] %vm15_vm1, %v106_v42 }
 0x13a   :  { %v123_v63 = vld [vmem:[#allocation4] sm:$0xff] }
 0x1b0   :  { %v70_v49 = vpop.xlane.xlu1 %69 }
 0x1b1   :  { %v74_v51 = vadd.f32 %v70_v49, %v50_v47 }
 0x1b3   :  { %77 = vst.msk [vmem:[#allocation3] sm:$0xff] %vm15_vm1, %v74_v51 }
 0x1b4   :  { %v73_v53 = vpop.xlane.xlu1 %72 }
 0x1b5   :  { %v75_v54 = vadd.f32 %v73_v53, %v51_v52 }
 0x1b7   :  { %78 = vst.msk [vmem:[#allocation3 + $0x8] sm:$0xff] %vm15_vm1, %v75_v54 }
 0x1b8   :  { %v105_v56 = vpop.xlane.xlu1 %104 }
 0x1b9   :  { %v107_v57 = vadd.f32 %v105_v56, %v99_v55 }
 0x1ba   :  { %v115_v58 = vld [vmem:[#allocation3] sm:$0xff] }
 0x1bb   :  { %153 = vlog2.f32 %v115_v58  ;;  %109 = vst.msk [vmem:[#allocation4 + $0x8] sm:$0xff] %vm15_vm1, %v107_v57 }
 0x1be   :  { %v116_v59 = vld [vmem:[#allocation3 + $0x8] sm:$0xff] }
 0x1bf   :  { %155 = vlog2.f32 %v116_v59 }
 0x1c2   :  { %v124_v8 = vld [vmem:[#allocation4 + $0x8] sm:$0xff] }
 0x1c5   :  { %v154_v60 = vpop.eup %153 }
 0x1c6   :  { %v118_v61 = vmul.f32 0.6931472, %v154_v60 }
 0x1c8   :  { %v121_v0 = vadd.f32 %v118_v61, %v113_v62 }
 0x1c9   :  { %v156_v1 = vpop.eup %155 }
 0x1ca   :  { %v120_v2 = vmul.f32 0.6931472, %v156_v1  ;;  %v125_v3 = vsub.f32 %v123_v63, %v121_v0 }
 0x1cc   :  { %v122_v5 = vadd.f32 %v120_v2, %v114_v4  ;;  %v127_v6 = vsub.f32 -0.66520274, %v125_v3 }
 0x1ce   :  { %v126_v9 = vsub.f32 %v124_v8, %v122_v5  ;;  %v131_v10 = vsel %vm129_vm5, %v127_v6, 0.0 }
 0x1cf   :  { %133 = vst.msk [vmem:[%s226_s2] sm:$0xff] %vm15_vm1, %v131_v10 }
 0x1d0   :  { %v128_v11 = vsub.f32 -0.66520274, %v126_v9 }
 0x1d2   :  { %v132_v12 = vsel %vm130_vm6, %v128_v11, 0.0 }
 0x1d3   :  { %134 = vst.msk [vmem:[%s226_s2 + $0x8] sm:$0xff] %vm15_vm1, %v132_v12 }

</bundles_post_ra>
